<compile_context>
chip_gen: v5e
topology: v5e:2x2
jax: 0.10.0
libtpu: 0.0.40
codegen_flags: <defaults>
</compile_context>

<pallas_src>
import jax
import jax.numpy as jnp
from jax import lax
from jax.experimental import pallas as pl
from jax.experimental.pallas import tpu as pltpu


# ----------------------------------------------------------------------------
# helpers
# ----------------------------------------------------------------------------
def _rup(x, m):
    return ((x + m - 1) // m) * m


def _pick_tile(dim_padded, unit, cap):
    """Largest multiple of `unit` that divides dim_padded and is <= cap."""
    best = unit
    t = unit
    top = min(cap, dim_padded)
    while t <= top:
        if dim_padded % t == 0:
            best = t
        t += unit
    return best


def _pad2d(x, rows, cols):
    r, c = x.shape
    if r == rows and c == cols:
        return x
    return jnp.pad(x, ((0, rows - r), (0, cols - c)))


def _apply_act(y, act):
    if act == "relu":
        return jnp.maximum(y, 0.0)
    if act == "tanh":
        return jnp.tanh(y)
    return y


# ----------------------------------------------------------------------------
# Pallas kernels
# ----------------------------------------------------------------------------
def _make_mm_kernel(act, has_res):
    """Tiled matmul, fused scale/shift (folded BN), optional residual add, activation."""
    if has_res:
        def kernel(a_ref, b_ref, s_ref, t_ref, r_ref, o_ref, acc_ref):
            @pl.when(pl.program_id(2) == 0)
            def _():
                acc_ref[...] = jnp.zeros_like(acc_ref)

            acc_ref[...] += jnp.dot(a_ref[...], b_ref[...],
                                    preferred_element_type=jnp.float32)

            @pl.when(pl.program_id(2) == pl.num_programs(2) - 1)
            def _():
                y = acc_ref[...] * s_ref[...] + t_ref[...] + r_ref[...]
                o_ref[...] = _apply_act(y, act).astype(o_ref.dtype)
        return kernel

    def kernel(a_ref, b_ref, s_ref, t_ref, o_ref, acc_ref):
        @pl.when(pl.program_id(2) == 0)
        def _():
            acc_ref[...] = jnp.zeros_like(acc_ref)

        acc_ref[...] += jnp.dot(a_ref[...], b_ref[...],
                                preferred_element_type=jnp.float32)

        @pl.when(pl.program_id(2) == pl.num_programs(2) - 1)
        def _():
            y = acc_ref[...] * s_ref[...] + t_ref[...]
            o_ref[...] = _apply_act(y, act).astype(o_ref.dtype)
    return kernel


def matmul_fused(a, b, scale, shift, act="none", residual=None):
    """out = act((a @ b) * scale + shift [+ residual]).

    a: (M, K) float (cast to bf16), b: (K, N) bf16, scale/shift: (N,) f32,
    residual: (M, N) f32 or None.  Returns f32 (M, N)."""
    M, K = a.shape
    K2, N = b.shape
    assert K == K2

    Mp, Kp, Np = _rup(M, 8), _rup(K, 128), _rup(N, 128)
    tm = _pick_tile(Mp, 8, 256)                     # adaptive M tile (M can be 8)
    tk = _pick_tile(Kp, 128, 2048)                  # deep K tiles for the 2048-ch GEMMs
    tn_cap = 1024 if Mp <= 32 else 512              # weight-bound tiny-M layers: wider N
    tn = _pick_tile(Np, 128, tn_cap)

    a_p = _pad2d(a.astype(jnp.bfloat16), Mp, Kp)    # bf16 halves HBM traffic, MXU native
    b_p = _pad2d(b.astype(jnp.bfloat16), Kp, Np)
    s_p = _pad2d(scale.astype(jnp.float32).reshape(1, N), 1, Np)
    t_p = _pad2d(shift.astype(jnp.float32).reshape(1, N), 1, Np)

    ins = [a_p, b_p, s_p, t_p]
    in_specs = [
        pl.BlockSpec((tm, tk), lambda i, j, k: (i, k)),
        pl.BlockSpec((tk, tn), lambda i, j, k: (k, j)),
        pl.BlockSpec((1, tn), lambda i, j, k: (0, j)),
        pl.BlockSpec((1, tn), lambda i, j, k: (0, j)),
    ]
    has_res = residual is not None
    if has_res:
        ins.append(_pad2d(residual.astype(jnp.float32), Mp, Np))
        in_specs.append(pl.BlockSpec((tm, tn), lambda i, j, k: (i, j)))

    out = pl.pallas_call(
        _make_mm_kernel(act, has_res),
        out_shape=jax.ShapeDtypeStruct((Mp, Np), jnp.float32),
        grid_spec=pltpu.PrefetchScalarGridSpec(
            0,
            grid=(Mp // tm, Np // tn, Kp // tk),
            in_specs=in_specs,
            out_specs=pl.BlockSpec((tm, tn), lambda i, j, k: (i, j)),
            scratch_shapes=[pltpu.VMEM((tm, tn), jnp.float32)],
        ),
        compiler_params=pltpu.CompilerParams(
            dimension_semantics=("parallel", "parallel", "arbitrary")),
    )(*ins)
    if Mp == M and Np == N:
        return out
    return out[:M, :N]


def _bn_relu_kernel(x_ref, s_ref, t_ref, o_ref):
    o_ref[...] = jnp.maximum(x_ref[...] * s_ref[...] + t_ref[...], 0.0)


def bn_relu(x, scale, shift):
    """Fused eval-mode BatchNorm + ReLU over an NHWC tensor (single HBM round trip)."""
    N, H, W, C = x.shape
    M = N * H * W
    Mp, Cp = _rup(M, 8), _rup(C, 128)
    tm = _pick_tile(Mp, 8, 512)
    xf = _pad2d(x.reshape(M, C).astype(jnp.float32), Mp, Cp)
    sp = _pad2d(scale.astype(jnp.float32).reshape(1, C), 1, Cp)
    tp = _pad2d(shift.astype(jnp.float32).reshape(1, C), 1, Cp)
    out = pl.pallas_call(
        _bn_relu_kernel,
        out_shape=jax.ShapeDtypeStruct((Mp, Cp), jnp.float32),
        grid_spec=pltpu.PrefetchScalarGridSpec(
            0, grid=(Mp // tm,),
            in_specs=[pl.BlockSpec((tm, Cp), lambda i: (i, 0)),
                      pl.BlockSpec((1, Cp), lambda i: (0, 0)),
                      pl.BlockSpec((1, Cp), lambda i: (0, 0))],
            out_specs=pl.BlockSpec((tm, Cp), lambda i: (i, 0)),
        ),
        compiler_params=pltpu.CompilerParams(dimension_semantics=("parallel",)),
    )(xf, sp, tp)
    return out[:M, :C].reshape(N, H, W, C)


# ----------------------------------------------------------------------------
# Conv / ConvTranspose / MaxPool built on the Pallas matmul
# ----------------------------------------------------------------------------
def conv2d(x, w2d, k, scale, shift, *, stride=1, padding=0, pad_mode="zeros",
           act="none", residual=None):
    """x: NHWC f32, w2d: (k*k*Cin, Cout) bf16 with row order (kh, kw, cin)."""
    if padding > 0:
        mode = "reflect" if pad_mode == "reflect" else "constant"
        x = jnp.pad(x, ((0, 0), (padding, padding), (padding, padding), (0, 0)),
                    mode=mode)
    N, Hp, Wp, Cin = x.shape
    Ho = (Hp - k) // stride + 1
    Wo = (Wp - k) // stride + 1
    if k == 1 and stride == 1:
        a = x.reshape(N * Ho * Wo, Cin)
    else:
        # TODO(synk): im2col materialized with XLA slices/concat; in-kernel tap
        #             offsets via index_map would cut activation traffic further.
        cols = []
        for kh in range(k):
            for kw in range(k):
                cols.append(x[:, kh:kh + Ho * stride:stride,
                              kw:kw + Wo * stride:stride, :])
        a = jnp.concatenate(cols, axis=-1).reshape(N * Ho * Wo, k * k * Cin)
    res = None if residual is None else residual.reshape(N * Ho * Wo, -1)
    out = matmul_fused(a, w2d, scale, shift, act=act, residual=res)
    return out.reshape(N, Ho, Wo, -1)


def apply_conv(x, cw, scale, shift, **kw):
    return conv2d(x, cw["w"], cw["k"], scale, shift, **kw)


def conv_transpose2d(x, dec):
    """x: NHWC; dec['w'] is the preprocessed (k*k*Cin, Cout) bf16 equivalent-conv weight."""
    k, s, p = dec["k"], dec["stride"], dec["padding"]
    N, H, W, C = x.shape
    if s > 1:
        # TODO(synk): zero-stuffed equivalent conv; a sub-pixel (phase-decomposed)
        #             convolution would skip the ~75% structurally-zero taps.
        xd = jnp.zeros((N, (H - 1) * s + 1, (W - 1) * s + 1, C), x.dtype)
        xd = xd.at[:, ::s, ::s, :].set(x)
    else:
        xd = x
    return conv2d(xd, dec["w"], k, dec["scale"], dec["shift"],
                  stride=1, padding=k - 1 - p, act=dec["act"])


def maxpool2d(x, k=3, s=2, p=1):
    # TODO(synk): small window max-reduce kept as lax.reduce_window glue (not Pallas).
    return lax.reduce_window(x, -jnp.inf, lax.max,
                             window_dimensions=(1, k, k, 1),
                             window_strides=(1, s, s, 1),
                             padding=((0, 0), (p, p), (p, p), (0, 0)))


# ----------------------------------------------------------------------------
# Deterministic parameter construction (weight preprocessing hoisted here)
# ----------------------------------------------------------------------------
_KEY = jax.random.PRNGKey(0)
_CTR = [0]


def _next_key():
    _CTR[0] += 1
    return jax.random.fold_in(_KEY, _CTR[0])


def conv_w(k, cin, cout):
    std = (2.0 / (k * k * cin)) ** 0.5
    w = std * jax.random.normal(_next_key(), (k, k, cin, cout), jnp.float32)
    return {"w": w.reshape(k * k * cin, cout).astype(jnp.bfloat16), "k": k}


def deconv_w(cin, cout, k):
    std = (2.0 / (k * k * cin)) ** 0.5
    w_t = std * jax.random.normal(_next_key(), (cin, cout, k, k), jnp.float32)
    # equivalent regular conv weight: flip spatially, (KH, KW, Cin, Cout), flatten
    w = jnp.flip(w_t, axis=(2, 3)).transpose(2, 3, 0, 1)
    return w.reshape(k * k * cin, cout).astype(jnp.bfloat16)


def bn_params(c):
    gamma = 1.0 + 0.1 * jax.random.normal(_next_key(), (c,), jnp.float32)
    beta = 0.05 * jax.random.normal(_next_key(), (c,), jnp.float32)
    mean = 0.05 * jax.random.normal(_next_key(), (c,), jnp.float32)
    var = 1.0 + 0.1 * jnp.abs(jax.random.normal(_next_key(), (c,), jnp.float32))
    scale = gamma / jnp.sqrt(var + 1e-5)
    shift = beta - mean * scale
    return scale, shift


def build_params(input_nc=3, channel=2048):
    p = {"conv1": conv_w(7, input_nc, 64), "bn1": bn_params(64)}
    # ResNet-50 layers (Bottleneck, expansion 4, stride on the 3x3 conv).
    layers = []
    inplanes = 64
    for planes, nblocks, stride in [(64, 3, 1), (128, 4, 2), (256, 6, 2), (512, 3, 2)]:
        blocks = []
        for b in range(nblocks):
            s = stride if b == 0 else 1
            blk = {
                "stride": s,
                "conv1": conv_w(1, inplanes, planes), "bn1": bn_params(planes),
                "conv2": conv_w(3, planes, planes), "bn2": bn_params(planes),
                "conv3": conv_w(1, planes, planes * 4), "bn3": bn_params(planes * 4),
            }
            if s != 1 or inplanes != planes * 4:
                blk["down"] = conv_w(1, inplanes, planes * 4)
                blk["down_bn"] = bn_params(planes * 4)
            blocks.append(blk)
            inplanes = planes * 4
        layers.append(blocks)
    p["layers"] = layers
    # 6 ResnetBlocks at `channel` channels (reflect padding, BN, no bias).
    p["resnet_part"] = [{
        "c1": conv_w(3, channel, channel), "bn1": bn_params(channel),
        "c2": conv_w(3, channel, channel), "bn2": bn_params(channel),
    } for _ in range(6)]
    # Decoder ConvTranspose2d layers (bias=False since BatchNorm2d follows).
    dec_cfg = [(2048, 1024, 4, 2, 1, True, "relu"),
               (2048, 512, 4, 2, 1, True, "relu"),
               (1024, 256, 4, 2, 1, True, "relu"),
               (512, 128, 4, 2, 1, True, "relu"),
               (128, 64, 3, 1, 1, True, "relu"),
               (128, 3, 4, 2, 1, False, "tanh")]
    dec = []
    for cin, cout, k, s, pd, has_norm, act in dec_cfg:
        w = deconv_w(cin, cout, k)
        if has_norm:
            scale, shift = bn_params(cout)
        else:
            scale = jnp.ones((cout,), jnp.float32)
            shift = jnp.zeros((cout,), jnp.float32)
        dec.append({"w": w, "k": k, "stride": s, "padding": pd,
                    "scale": scale, "shift": shift, "act": act})
    p["decoder"] = dec
    return p


# ----------------------------------------------------------------------------
# Model application
# ----------------------------------------------------------------------------
def apply_bottleneck(x, blk):
    s = blk["stride"]
    identity = x
    out = apply_conv(x, blk["conv1"], *blk["bn1"], act="relu")
    out = apply_conv(out, blk["conv2"], *blk["bn2"], stride=s, padding=1, act="relu")
    if "down" in blk:
        identity = apply_conv(x, blk["down"], *blk["down_bn"], stride=s)
    # conv3 + bn3 + residual add + ReLU fused in the Pallas epilogue
    return apply_conv(out, blk["conv3"], *blk["bn3"], act="relu", residual=identity)


def apply_resnet_block(x, blk):
    # ReflectionPad -> Conv3x3 -> BN -> ReLU -> ReflectionPad -> Conv3x3 -> BN, + skip
    out = apply_conv(x, blk["c1"], *blk["bn1"], padding=1, pad_mode="reflect",
                     act="relu")
    return apply_conv(out, blk["c2"], *blk["bn2"], padding=1, pad_mode="reflect",
                      residual=x)


def para_gan_forward(x_nchw, p):
    x = jnp.transpose(x_nchw, (0, 2, 3, 1)).astype(jnp.float32)   # NCHW -> NHWC
    ones64 = jnp.ones((64,), jnp.float32)
    zeros64 = jnp.zeros((64,), jnp.float32)

    # encoder[0]: conv1 (its raw, pre-BN output is a skip feature)
    f0 = apply_conv(x, p["conv1"], ones64, zeros64, stride=2, padding=3)
    # encoder[1]+[2]: BatchNorm + ReLU fused into one elementwise Pallas pass
    f = bn_relu(f0, *p["bn1"])
    f = maxpool2d(f)                                              # encoder[3]
    feats = []
    for blocks in p["layers"]:                                    # encoder[4..7]
        for blk in blocks:
            f = apply_bottleneck(f, blk)
        feats.append(f)
    e4, e5, e6, e7 = feats

    d = e7
    for blk in p["resnet_part"]:
        d = apply_resnet_block(d, blk)

    skips = [e6, e5, e4]
    outs = []
    for i in range(5):
        d = conv_transpose2d(d, p["decoder"][i])
        outs.append(d)
        if i < 3:
            d = jnp.concatenate([d, skips[i]], axis=-1)           # skip connections
    d = jnp.concatenate([d, f0], axis=-1)
    d = conv_transpose2d(d, p["decoder"][5])
    outs.append(d)
    return [jnp.transpose(o, (0, 3, 1, 2)) for o in outs]          # back to NCHW


# ----------------------------------------------------------------------------
if __name__ == "__main__":
    params = build_params(input_nc=3, channel=2048)
    # 64x64 is the smallest spatial size keeping every stage (incl. layer4 @ 2x2,
    # reflect-padded ResnetBlocks) well-defined; ResNet-50 / decoder channel widths
    # are fixed by the module.
    x = jax.random.normal(jax.random.PRNGKey(0), (2, 3, 64, 64), jnp.float32)

    outs = para_gan_forward(x, params)
    outs = jax.block_until_ready(outs)

    expected = [(2, 1024, 4, 4), (2, 512, 8, 8), (2, 256, 16, 16),
                (2, 128, 32, 32), (2, 64, 32, 32), (2, 3, 64, 64)]
    got = [tuple(o.shape) for o in outs]
    assert got == expected, got
    assert all(bool(jnp.all(jnp.isfinite(o))) for o in outs)
    print("KERNEL_OK")
</pallas_src>

<mosaic_0001>
module attributes {stable_mosaic.version = 11 : i64} {
  func.func @kernel(%arg0: i32, %arg1: i32, %arg2: i32, %arg3: memref<256x256xbf16, #tpu.memory_space<vmem>>, %arg4: memref<256x128xbf16, #tpu.memory_space<vmem>>, %arg5: memref<1x128xf32, #tpu.memory_space<vmem>>, %arg6: memref<1x128xf32, #tpu.memory_space<vmem>>, %arg7: memref<256x128xf32, #tpu.memory_space<vmem>>, %arg8: memref<256x128xf32, #tpu.memory_space<vmem>>) attributes {dimension_semantics = [#tpu.dimension_semantics<parallel>, #tpu.dimension_semantics<parallel>, #tpu.dimension_semantics<arbitrary>], iteration_bounds = array<i64: 8, 1, 1>, scalar_prefetch = 0 : i64, scratch_operands = 1 : i64, tpu.core_type = #tpu.core_type<tc>, window_params = [{transform_indices = @transform_0, window_bounds = array<i64: 256, 256>}, {transform_indices = @transform_1, window_bounds = array<i64: 256, 128>}, {transform_indices = @transform_2, window_bounds = array<i64: 1, 128>}, {transform_indices = @transform_3, window_bounds = array<i64: 1, 128>}, {transform_indices = @transform_4, window_bounds = array<i64: 256, 128>}]} {
    %c0_i32 = arith.constant 0 : i32
    %0 = arith.cmpi eq, %arg2, %c0_i32 : i32
    %1 = arith.extui %0 : i1 to i32
    %c0_i32_0 = arith.constant 0 : i32
    %2 = arith.cmpi ne, %1, %c0_i32_0 : i32
    scf.if %2 {
      %cst_10 = arith.constant 0.000000e+00 : f32
      %12 = vector.broadcast %cst_10 : f32 to vector<256x128xf32>
      %c0_11 = arith.constant 0 : index
      %c0_12 = arith.constant 0 : index
      %13 = vector.load %arg8[%c0_11, %c0_12] : memref<256x128xf32, #tpu.memory_space<vmem>>, vector<256x128xf32>
      tpu.vector_store %arg8[%c0_11, %c0_12], %12 {strides = array<i32>} : memref<256x128xf32, #tpu.memory_space<vmem>>, vector<256x128xf32>,
    } else {
    }
    %c0 = arith.constant 0 : index
    %c0_1 = arith.constant 0 : index
    %3 = vector.load %arg8[%c0, %c0_1] : memref<256x128xf32, #tpu.memory_space<vmem>>, vector<256x128xf32>
    %c0_2 = arith.constant 0 : index
    %c0_3 = arith.constant 0 : index
    %4 = vector.load %arg3[%c0_2, %c0_3] : memref<256x256xbf16, #tpu.memory_space<vmem>>, vector<256x256xbf16>
    %c0_4 = arith.constant 0 : index
    %c0_5 = arith.constant 0 : index
    %5 = vector.load %arg4[%c0_4, %c0_5] : memref<256x128xbf16, #tpu.memory_space<vmem>>, vector<256x128xbf16>
    %cst = arith.constant dense<0.000000e+00> : vector<256x128xf32>
    %6 = tpu.matmul %4, %5, %cst {dimension_numbers = #tpu.dot_dimension_numbers<[1], [0], [0], [1], [0, 0, 1, 1], [], []>} : vector<256x256xbf16>, vector<256x128xbf16>, vector<256x128xf32> -> vector<256x128xf32>
    %7 = arith.addf %3, %6 : vector<256x128xf32>
    %c0_6 = arith.constant 0 : index
    %c0_7 = arith.constant 0 : index
    %8 = vector.load %arg8[%c0_6, %c0_7] : memref<256x128xf32, #tpu.memory_space<vmem>>, vector<256x128xf32>
    tpu.vector_store %arg8[%c0_6, %c0_7], %7 {strides = array<i32>} : memref<256x128xf32, #tpu.memory_space<vmem>>, vector<256x128xf32>,
    %c0_i32_8 = arith.constant 0 : i32
    %9 = arith.cmpi eq, %arg2, %c0_i32_8 : i32
    %10 = arith.extui %9 : i1 to i32
    %c0_i32_9 = arith.constant 0 : i32
    %11 = arith.cmpi ne, %10, %c0_i32_9 : i32
    scf.if %11 {
      %c0_10 = arith.constant 0 : index
      %c0_11 = arith.constant 0 : index
      %12 = vector.load %arg8[%c0_10, %c0_11] : memref<256x128xf32, #tpu.memory_space<vmem>>, vector<256x128xf32>
      %c0_12 = arith.constant 0 : index
      %c0_13 = arith.constant 0 : index
      %13 = vector.load %arg5[%c0_12, %c0_13] : memref<1x128xf32, #tpu.memory_space<vmem>>, vector<1x128xf32>
      %14 = vector.broadcast %13 : vector<1x128xf32> to vector<256x128xf32>
      %15 = arith.mulf %12, %14 : vector<256x128xf32>
      %c0_14 = arith.constant 0 : index
      %c0_15 = arith.constant 0 : index
      %16 = vector.load %arg6[%c0_14, %c0_15] : memref<1x128xf32, #tpu.memory_space<vmem>>, vector<1x128xf32>
      %17 = vector.broadcast %16 : vector<1x128xf32> to vector<256x128xf32>
      %18 = arith.addf %15, %17 : vector<256x128xf32>
      %c0_16 = arith.constant 0 : index
      %c0_17 = arith.constant 0 : index
      %19 = vector.load %arg7[%c0_16, %c0_17] : memref<256x128xf32, #tpu.memory_space<vmem>>, vector<256x128xf32>
      tpu.vector_store %arg7[%c0_16, %c0_17], %18 {strides = array<i32>} : memref<256x128xf32, #tpu.memory_space<vmem>>, vector<256x128xf32>,
    } else {
    }
    return
  }
  func.func @transform_0(%arg0: i32, %arg1: i32, %arg2: i32) -> (i32, i32) {
    %c0_i32 = arith.constant 0 : i32
    return %arg0, %arg2 : i32, i32
  }
  func.func @transform_1(%arg0: i32, %arg1: i32, %arg2: i32) -> (i32, i32) {
    %c0_i32 = arith.constant 0 : i32
    return %arg2, %arg1 : i32, i32
  }
  func.func @transform_2(%arg0: i32, %arg1: i32, %arg2: i32) -> (i32, i32) {
    %c0_i32 = arith.constant 0 : i32
    %c0_i32_0 = arith.constant 0 : i32
    return %c0_i32, %arg1 : i32, i32
  }
  func.func @transform_3(%arg0: i32, %arg1: i32, %arg2: i32) -> (i32, i32) {
    %c0_i32 = arith.constant 0 : i32
    %c0_i32_0 = arith.constant 0 : i32
    return %c0_i32, %arg1 : i32, i32
  }
  func.func @transform_4(%arg0: i32, %arg1: i32, %arg2: i32) -> (i32, i32) {
    %c0_i32 = arith.constant 0 : i32
    return %arg0, %arg1 : i32, i32
  }
}

</mosaic_0001>

<bundles_post_ra>
// kernel: tpu_custom_call.1
= control target key start
LH: loop header
LB: loop body
LE: loop exit
PB: predicated region body
PF: predicated region fallthrough
CT: control target
= control target key end

     0   :  { %s2083_s0 = inlined_call_operand.hbm [shape: bf16[2048,256], index: 0, kind: input, shape index: {}]   ;;  %s2084_s1 = inlined_call_operand.hbm [shape: bf16[256,128], index: 1, kind: input, shape index: {}]   ;;  %s2085_s2 = inlined_call_operand.vmem [shape: f32[1,128], index: 2, kind: input, shape index: {}]   ;;  %s2086_s3 = inlined_call_operand.vmem [shape: f32[1,128], index: 3, kind: input, shape index: {}]   ;;  %s2087_s4 = inlined_call_operand.hbm [shape: f32[2048,128], index: 4, kind: output, shape index: {}]  }
   0x1   :  { %2089 = sst [smem:[#allocation13_spill]] %s2084_s1 }
   0x2   :  { %9 = vsyncpa [#allocation4], 0 }
   0x3   :  { %11 = vsyncpa [#allocation4 + $0x1], 0 }
   0x4   :  { %12 = vsyncpa [#allocation7], 0 }
   0x5   :  { %13 = vsyncpa [#allocation5], 0 }
   0x6   :  { %15 = vsyncpa [#allocation5 + $0x1], 0  ;;  %s1757_s15 = smov 0   ;;  %s1759_s16 = smov 0  }
   0x7   :  { %s1761_s17 = smov 0   ;;  %s1763_s18 = smov 0  }
   0x8   :  { %s1765_s19 = smov 0   ;;  %s1767_s20 = smov 0  }
   0x9 LB: > { %s1217_s21 = sadd.s32 4294967295, %s1723_s20   ;;  %s1218_s22 = sadd.s32 4294967294, %s1723_s20   ;;  %s1723_s20 = sphi %s1767_s20, %s21_s20   ;;  %s1719_s19 = sphi %s1765_s19, %s2104_s19   ;;  %s1715_s18 = sphi %s1763_s18, %s2103_s18   ;;  %s1711_s17 = sphi %s1761_s17, %s2102_s17   ;;  %s1707_s16 = sphi %s1759_s16, %s2101_s16   ;;  %s1703_s15 = sphi %s1757_s15, %s2100_s15  }
   0xa   : > { %p62_p0 = scmp.ne.s32.totalorder %s1707_s16, %s1703_s15  ;;  %p1791_p1 = scmp.eq.s32.totalorder %s1217_s21, 0 }
   0xb   : > { %p1795_p2 = scmp.eq.s32.totalorder %s1217_s21, 7  ;;  %p174_p3 = scmp.eq.s32.totalorder %s1218_s22, 7 }
   0xc   : > { %p1801_p4 = por %p1791_p1, %p62_p0  ;;  %p1219_p5 = scmp.ge.s32.totalorder %s1723_s20, 1 }
   0xd   : > { %p1806_p6 = por %p174_p3, %p62_p0  ;;  %p181_p7 = scmp.lt.s32.totalorder %s1723_s20, 9 }
   0xe   : > { %s2094_s1 = sld [smem:[#allocation13_spill]]  ;;  %s1725_s5 = smov [#allocation6]  }
   0xf   : > { %p1814_p8 = pnand %p1219_p5, %p181_p7  ;;  %s198_s6 = sshll.u32 %s1725_s5, 4  ;;  %s199_s6 = int_to_ptr.vmem [resolvable:$true] %s198_s6 }
  0x10   : > { %s1726_s7 = smov 64   ;;  %s1727_s8 = smov 4  }
  0x11   : > { %p1504_p9 = pneg %p1814_p8  ;;  %s40_s9 = sadd.s32 1, %s1719_s19 }
  0x12   : > { %p42_p11 = scmp.ge.s32.totalorder %s40_s9, 8  ;;  %s49_s10 = sadd.s32 1, %s1711_s17 }
  0x13   : > { %p1505_p10 = pnand %p1504_p9, %p1791_p1  ;;  %p56_p12 = scmp.ne.s32.totalorder %s1711_s17, %s1707_s16 }
  0x14   : > { %s196_s29 = sshll.u32 %s2094_s1, 4  ;;  %p57_p13 = scmp.eq.s32.totalorder %s1723_s20, 0  ;;  %s197_s29 = int_to_ptr.hbm [resolvable:$true] %s196_s29 }
  0x15   : > { %1507 = dma.hbm_to_vmem [thread:$0]  (!%p1505_p10), %s197_s29, 2048, %s199_s6, [#allocation7], %s1726_s7, %s1726_s7, %s1727_s8  }
  0x16   : > { %s2106_s9 = smov (%p42_p11, %s40_s9), 0  ;;  %p1829_p0 = por %p57_p13, %p56_p12 }
  0x17   : > { %2096 = sst [smem:[#allocation12_spill]] %s2106_s9  ;;  %p1835_p3 = por %p1795_p2, %p56_p12 }
  0x18   : > { %s44_s13 = ssub.s32 %s1719_s19, %s2106_s9  ;;  %p1517_p5 = scmp.lt.s32.totalorder %s1723_s20, 8 }
  0x19   : > { %p47_p7 = scmp.eq.s32.totalorder %s44_s13, 0  ;;  %s224_s14 = sand.u32 1, %s1711_s17  }
  0x1a   : > { %s1224_s21 = sshll.u32 %s224_s14, 8  ;;  %s1430_s27 = sshll.u32 %s1719_s19, 8 }
  0x1b   : > { %s1844_s22 = scalar_select %p47_p7, %s1711_s17, %s49_s10  }
  0x1c   : > { %s236_s5 = scalar_lea.hbm %s2083_s0, %s1430_s27  ;;  %s228_s6 = scalar_lea.vmem [#allocation3], %s1224_s21 }
  0x1d   : > { %s239_s7 = sshll.u32 %s228_s6, 4  ;;  %s237_s24 = sshll.u32 %s236_s5, 4  ;;  %s240_s7 = int_to_ptr.vmem [resolvable:$true] %s239_s7  ;;  %s238_s24 = int_to_ptr.hbm [resolvable:$true] %s237_s24 }
  0x1e   : > { %p1509_p2 = pnand %p1517_p5, %p1829_p0  ;;  %s225_s8 = scalar_lea.sflag [#allocation4], %s224_s14 }
  0x1f   : > { %s1728_s1 = smov 128   ;;  %s1729_s9 = smov 8  }
  0x20   : > { %1511 = dma.hbm_to_vmem [thread:$0]  (!%p1509_p2), %s238_s24, 4096, %s240_s7, %s225_s8, %s1728_s1, %s1728_s1, %s1729_s9  }
  0x21   : > { %251 = sbr.rel (%p1814_p8) target bundleno = 336 (0x150), region = 36  ;;  %s1855_s10 = sand.u32 (!%p1814_p8), 1, %s1707_s16  }
  0x22   : > { %s1229_s13 = sshll.u32 (!%p1814_p8), %s1855_s10, 8  ;;  %s254_s21 = scalar_lea.sflag (!%p1814_p8), [#allocation4], %s1855_s10 }
  0x23   : > { %s1861_s27 = scalar_lea.vmem (!%p1814_p8), [#allocation3], %s1229_s13 }
  0x26   : > { %1690 = dma.done.wait (%p1801_p4), %s254_s21, 4096  }
  0x27   : > { %1692 = vsyncadd (%p1801_p4), %s254_s21, 4294963200 }
  0x28   : > { %1694 = dma.done.wait (%p1791_p1), [#allocation7], 2048  }
  0x29   : > { %1696 = vsyncadd (%p1791_p1), [#allocation7], 4294965248  ;;  %v1470_v0 = vld [vmem:[#allocation6 + $0x38] sm:$0xff]  ;;  %v1469_v2 = vld [vmem:[#allocation6 + $0x30] sm:$0xff]  ;;  %s1949_s9 = scalar_lea.vmem [#allocation8], %s1229_s13  ;;  %s1479_s11 = sshll.u32 %s1715_s18, 8 }
  0x2a   : > { %v1478_v1 = vld [vmem:[#allocation6 + $0x78] sm:$0xff]  ;;  %692 = vmatpush.bf16.msra.mxu0 %v1470_v0  ;;  %1480 = vmatpush.bf16.msra.mxu2 %v1470_v0  ;;  %v1477_v3 = vld [vmem:[#allocation6 + $0x70] sm:$0xff]  ;;  %v1468_v4 = vld [vmem:[#allocation6 + $0x28] sm:$0xff]  ;;  %s1086_s29 = scalar_lea.hbm %s2087_s4, %s1479_s11  ;;  %s1087_s5 = sshll.u32 %s1949_s9, 4  ;;  %s1088_s5 = int_to_ptr.vmem [resolvable:$true] %s1087_s5 }
  0x2b   : > { %781 = vmatpush.bf16.msra.mxu1 %v1478_v1  ;;  %1488 = vmatpush.bf16.msra.mxu3 %v1478_v1  ;;  %v1476_v5 = vld [vmem:[#allocation6 + $0x68] sm:$0xff]  ;;  %v1467_v6 = vld [vmem:[#allocation6 + $0x20] sm:$0xff]  ;;  %v1466_v8 = vld [vmem:[#allocation6 + $0x18] sm:$0xff]  ;;  %s1089_s18 = sshll.u32 %s1086_s29, 4  ;;  %s1074_s6 = scalar_lea.sflag [#allocation5], %s1855_s10  ;;  %s1090_s18 = int_to_ptr.hbm [resolvable:$true] %s1089_s18 }
  0x2c   : > { %v1475_v7 = vld [vmem:[#allocation6 + $0x60] sm:$0xff]  ;;  %v1474_v9 = vld [vmem:[#allocation6 + $0x58] sm:$0xff]  ;;  %v1465_v10 = vld [vmem:[#allocation6 + $0x10] sm:$0xff]  ;;  %s1651_s7 = sshra.s32 %s1090_s18, 4  ;;  %s1657_s21 = scalar_lea.hbm %s2087_s4, 2048  ;;  %s1652_s7 = int_to_ptr.hbm [resolvable:$true] %s1651_s7 }
  0x2d   : > { %v1473_v11 = vld [vmem:[#allocation6 + $0x50] sm:$0xff]  ;;  %v1464_v12 = vld [vmem:[#allocation6 + $0x8] sm:$0xff]  ;;  %v1463_v14 = vld [vmem:[#allocation6] sm:$0xff]  ;;  %s1653_s24 = scalar_lea.hbm %s1652_s7, 256  ;;  %p1658_p9 = scmp.lt.s32.totalorder %s1652_s7, %s2087_s4 }
  0x2e   : > { %693 = vmatpush.bf16.msra.mxu0 %v1469_v2  ;;  %1481 = vmatpush.bf16.msra.mxu2 %v1469_v2  ;;  %v1472_v13 = vld [vmem:[#allocation6 + $0x48] sm:$0xff]  ;;  %v1471_v15 = vld [vmem:[#allocation6 + $0x40] sm:$0xff]  ;;  %v1242_v28 = vld [vmem:[%s1861_s27 + $0x10] sm:$0xf]  ;;  %p1654_p1 = scmp.ne.s32.totalorder %s1652_s7, %s1653_s24  ;;  %p1659_p10 = scmp.lt.s32.totalorder %s1657_s21, %s1653_s24 }
  0x2f   : > { %782 = vmatpush.bf16.msra.mxu1 %v1477_v3  ;;  %1489 = vmatpush.bf16.msra.mxu3 %v1477_v3  ;;  %v1234_v16 = vld [vmem:[%s1861_s27] sm:$0xf]  ;;  %v1432_v17 = vld [vmem:[%s1861_s27 + $0x4] sm:$0xf0]  ;;  %v1431_v20 = vld [vmem:[%s1861_s27 + $0x4] sm:$0xf] }
  0x30   : > { %v1298_v18 = vld [vmem:[%s1861_s27 + $0x80] sm:$0xf]  ;;  %v1448_v19 = vld [vmem:[%s1861_s27 + $0x84] sm:$0xf0]  ;;  %v1236_v21 = vld [vmem:[%s1861_s27 + $0x8] sm:$0xf0]  ;;  %v1235_v24 = vor.u32 %v1432_v17, %v1234_v16  ;;  %p1655_p4 = pnand %p1654_p1, %p1835_p3  ;;  %p1660_p11 = por %p1659_p10, %p1658_p9 }
  0x31   : > { %v1447_v22 = vld [vmem:[%s1861_s27 + $0x84] sm:$0xf]  ;;  %v1300_v23 = vld [vmem:[%s1861_s27 + $0x88] sm:$0xf0]  ;;  %v1299_v25 = vor.u32 %v1448_v19, %v1298_v18  ;;  %v1239_v26 = vor.u32 %v1431_v20, %v1236_v21  ;;  %v1434_v29 = vld [vmem:[%s1861_s27 + $0x14] sm:$0xf0] }
  0x32   : > { %694 = vmatpush.bf16.msra.mxu0 %v1468_v4  ;;  %1482 = vmatpush.bf16.msra.mxu2 %v1468_v4  ;;  %v1303_v27 = vor.u32 %v1447_v22, %v1300_v23  ;;  %v1306_v30 = vld [vmem:[%s1861_s27 + $0x90] sm:$0xf]  ;;  %v1450_v31 = vld [vmem:[%s1861_s27 + $0x94] sm:$0xf0]  ;;  %v1433_v32 = vld [vmem:[%s1861_s27 + $0x14] sm:$0xf]  ;;  %v1243_v36 = vor.u32 %v1434_v29, %v1242_v28  ;;  %p1656_p8 = pneg %p1655_p4 }
  0x33   : > { %783 = vmatpush.bf16.msra.mxu1 %v1476_v5  ;;  %1490 = vmatpush.bf16.msra.mxu3 %v1476_v5  ;;  %v1244_v33 = vld [vmem:[%s1861_s27 + $0x18] sm:$0xf0]  ;;  %v1449_v34 = vld [vmem:[%s1861_s27 + $0x94] sm:$0xf]  ;;  %v1307_v37 = vor.u32 %v1450_v31, %v1306_v30  ;;  %v1250_v40 = vld [vmem:[%s1861_s27 + $0x20] sm:$0xf] }
  0x34   : > { %v1308_v35 = vld [vmem:[%s1861_s27 + $0x98] sm:$0xf0]  ;;  %v1247_v38 = vor.u32 %v1433_v32, %v1244_v33  ;;  %v1436_v41 = vld [vmem:[%s1861_s27 + $0x24] sm:$0xf0]  ;;  %v1314_v42 = vld [vmem:[%s1861_s27 + $0xa0] sm:$0xf]  ;;  %p1661_p12 = pnand %p1660_p11, %p1656_p8 }
  0x35   : > { %v1311_v39 = vor.u32 %v1449_v34, %v1308_v35  ;;  %v1452_v43 = vld [vmem:[%s1861_s27 + $0xa4] sm:$0xf0]  ;;  %v1435_v44 = vld [vmem:[%s1861_s27 + $0x24] sm:$0xf]  ;;  %v1252_v45 = vld [vmem:[%s1861_s27 + $0x28] sm:$0xf0]  ;;  %v1251_v48 = vor.u32 %v1436_v41, %v1250_v40 }
  0x36   : > { %695 = vmatpush.bf16.msra.mxu0 %v1467_v6  ;;  %1483 = vmatpush.bf16.msra.mxu2 %v1467_v6  ;;  %v1451_v46 = vld [vmem:[%s1861_s27 + $0xa4] sm:$0xf]  ;;  %v1316_v47 = vld [vmem:[%s1861_s27 + $0xa8] sm:$0xf0]  ;;  %v1315_v49 = vor.u32 %v1452_v43, %v1314_v42  ;;  %v1255_v50 = vor.u32 %v1435_v44, %v1252_v45  ;;  %v1258_v52 = vld [vmem:[%s1861_s27 + $0x30] sm:$0xf] }
  0x37   : > { %784 = vmatpush.bf16.msra.mxu1 %v1475_v7  ;;  %1491 = vmatpush.bf16.msra.mxu3 %v1475_v7  ;;  %v1319_v51 = vor.u32 %v1451_v46, %v1316_v47  ;;  %v1438_v53 = vld [vmem:[%s1861_s27 + $0x34] sm:$0xf0]  ;;  %v1322_v54 = vld [vmem:[%s1861_s27 + $0xb0] sm:$0xf]  ;;  %v1437_v56 = vld [vmem:[%s1861_s27 + $0x34] sm:$0xf] }
  0x38   : > { %v1454_v55 = vld [vmem:[%s1861_s27 + $0xb4] sm:$0xf0]  ;;  %v1260_v57 = vld [vmem:[%s1861_s27 + $0x38] sm:$0xf0]  ;;  %v1453_v58 = vld [vmem:[%s1861_s27 + $0xb4] sm:$0xf]  ;;  %v1259_v60 = vor.u32 %v1438_v53, %v1258_v52 }
  0x39   : > { %v1324_v59 = vld [vmem:[%s1861_s27 + $0xb8] sm:$0xf0]  ;;  %v1323_v61 = vor.u32 %v1454_v55, %v1322_v54  ;;  %v1263_v62 = vor.u32 %v1437_v56, %v1260_v57  ;;  %v1266_v0 = vld [vmem:[%s1861_s27 + $0x40] sm:$0xf]  ;;  %v1440_v1 = vld [vmem:[%s1861_s27 + $0x44] sm:$0xf0] }
  0x3a   : > { %696 = vmatpush.bf16.msra.mxu0 %v1466_v8  ;;  %1484 = vmatpush.bf16.msra.mxu2 %v1466_v8  ;;  %v1327_v63 = vor.u32 %v1453_v58, %v1324_v59  ;;  %v1330_v2 = vld [vmem:[%s1861_s27 + $0xc0] sm:$0xf]  ;;  %v1456_v3 = vld [vmem:[%s1861_s27 + $0xc4] sm:$0xf0]  ;;  %v1439_v4 = vld [vmem:[%s1861_s27 + $0x44] sm:$0xf]  ;;  %v1267_v8 = vor.u32 %v1440_v1, %v1266_v0 }
  0x3b   : > { %785 = vmatpush.bf16.msra.mxu1 %v1474_v9  ;;  %1492 = vmatpush.bf16.msra.mxu3 %v1474_v9  ;;  %v1268_v5 = vld [vmem:[%s1861_s27 + $0x48] sm:$0xf0]  ;;  %v1455_v6 = vld [vmem:[%s1861_s27 + $0xc4] sm:$0xf]  ;;  %v1331_v9 = vor.u32 %v1456_v3, %v1330_v2  ;;  %v1441_v16 = vld [vmem:[%s1861_s27 + $0x54] sm:$0xf] }
  0x3c   : > { %v1332_v7 = vld [vmem:[%s1861_s27 + $0xc8] sm:$0xf0]  ;;  %v1276_v17 = vld [vmem:[%s1861_s27 + $0x58] sm:$0xf0]  ;;  %v1457_v18 = vld [vmem:[%s1861_s27 + $0xd4] sm:$0xf] }
  0x3d   : > { %v1340_v19 = vld [vmem:[%s1861_s27 + $0xd8] sm:$0xf0]  ;;  %v1279_v22 = vor.u32 %v1441_v16, %v1276_v17  ;;  %v1443_v28 = vld [vmem:[%s1861_s27 + $0x64] sm:$0xf]  ;;  %v1284_v29 = vld [vmem:[%s1861_s27 + $0x68] sm:$0xf0] }
  0x3e   : > { %697 = vmatpush.bf16.msra.mxu0 %v1465_v10  ;;  %1485 = vmatpush.bf16.msra.mxu2 %v1465_v10  ;;  %v1271_v10 = vor.u32 %v1439_v4, %v1268_v5  ;;  %v1343_v23 = vor.u32 %v1457_v18, %v1340_v19  ;;  %v1459_v30 = vld [vmem:[%s1861_s27 + $0xe4] sm:$0xf]  ;;  %v1348_v31 = vld [vmem:[%s1861_s27 + $0xe8] sm:$0xf0]  ;;  %v1287_v34 = vor.u32 %v1443_v28, %v1284_v29  ;;  %v1445_v40 = vld [vmem:[%s1861_s27 + $0x74] sm:$0xf] }
  0x3f   : > { %786 = vmatpush.bf16.msra.mxu1 %v1473_v11  ;;  %1493 = vmatpush.bf16.msra.mxu3 %v1473_v11  ;;  %v1335_v11 = vor.u32 %v1455_v6, %v1332_v7  ;;  %v1351_v35 = vor.u32 %v1459_v30, %v1348_v31  ;;  %v1292_v41 = vld [vmem:[%s1861_s27 + $0x78] sm:$0xf0]  ;;  %v1461_v42 = vld [vmem:[%s1861_s27 + $0xf4] sm:$0xf]  ;;  %v1943_v52 = vld [vmem:[%s2086_s3] ss:$0 sm:$0xff] }
  0x40   : > { %v1356_v43 = vld [vmem:[%s1861_s27 + $0xf8] sm:$0xf0]  ;;  %v1295_v46 = vor.u32 %v1445_v40, %v1292_v41 }
  0x41   : > { %v1359_v47 = vor.u32 %v1461_v42, %v1356_v43 }
  0x42   : > { %698 = vmatpush.bf16.msra.mxu0 %v1464_v12  ;;  %1486 = vmatpush.bf16.msra.mxu2 %v1464_v12  ;;  %v1274_v12 = vld [vmem:[%s1861_s27 + $0x50] sm:$0xf] }
  0x43   : > { %787 = vmatpush.bf16.msra.mxu1 %v1472_v13  ;;  %1494 = vmatpush.bf16.msra.mxu3 %v1472_v13  ;;  %v1442_v13 = vld [vmem:[%s1861_s27 + $0x54] sm:$0xf0] }
  0x44   : > { %v1275_v20 = vor.u32 %v1442_v13, %v1274_v12 }
  0x46   : > { %699 = vmatpush.bf16.msra.mxu0 %v1463_v14  ;;  %1487 = vmatpush.bf16.msra.mxu2 %v1463_v14  ;;  %v1338_v14 = vld [vmem:[%s1861_s27 + $0xd0] sm:$0xf] }
  0x47   : > { %788 = vmatpush.bf16.msra.mxu1 %v1471_v15  ;;  %1495 = vmatpush.bf16.msra.mxu3 %v1471_v15  ;;  %v1458_v15 = vld [vmem:[%s1861_s27 + $0xd4] sm:$0xf0] }
  0x48   : > { %v1339_v21 = vor.u32 %v1458_v15, %v1338_v14 }
  0x49   : > { %700 = vmatmul.bf16.vlgmr.msra.gmra.mxu0 %v1235_v24  ;;  %740 = vmatmul.bf16.vlgmr.msra.gmra.mxu2 %v1299_v25  ;;  %v1282_v24 = vld [vmem:[%s1861_s27 + $0x60] sm:$0xf]  ;;  %v1444_v25 = vld [vmem:[%s1861_s27 + $0x64] sm:$0xf0] }
  0x4a   : > { %789 = vmatmul.bf16.vlgmr.msra.gmra.mxu1 %v1239_v26  ;;  %829 = vmatmul.bf16.vlgmr.msra.gmra.mxu3 %v1303_v27  ;;  %v1346_v26 = vld [vmem:[%s1861_s27 + $0xe0] sm:$0xf]  ;;  %v1460_v27 = vld [vmem:[%s1861_s27 + $0xe4] sm:$0xf0]  ;;  %v1283_v32 = vor.u32 %v1444_v25, %v1282_v24 }
  0x4b   : > { %v1347_v33 = vor.u32 %v1460_v27, %v1346_v26 }
  0x59   : > { %705 = vmatmul.bf16.gmra.mxu0 %v1243_v36  ;;  %745 = vmatmul.bf16.gmra.mxu2 %v1307_v37  ;;  %v1290_v36 = vld [vmem:[%s1861_s27 + $0x70] sm:$0xf]  ;;  %v1446_v37 = vld [vmem:[%s1861_s27 + $0x74] sm:$0xf0] }
  0x5a   : > { %794 = vmatmul.bf16.gmra.mxu1 %v1247_v38  ;;  %834 = vmatmul.bf16.gmra.mxu3 %v1311_v39  ;;  %v1354_v38 = vld [vmem:[%s1861_s27 + $0xf0] sm:$0xf]  ;;  %v1462_v39 = vld [vmem:[%s1861_s27 + $0xf4] sm:$0xf0]  ;;  %v1291_v44 = vor.u32 %v1446_v37, %v1290_v36 }
  0x5b   : > { %v1355_v45 = vor.u32 %v1462_v39, %v1354_v38 }
  0x69   : > { %710 = vmatmul.bf16.gmra.mxu0 %v1251_v48  ;;  %750 = vmatmul.bf16.gmra.mxu2 %v1315_v49  ;;  %v1938_v49 = vld [vmem:[%s2085_s2] ss:$0 sm:$0xff] }
  0x6a   : > { %799 = vmatmul.bf16.gmra.mxu1 %v1255_v50  ;;  %839 = vmatmul.bf16.gmra.mxu3 %v1319_v51 }
  0x79   : > { %715 = vmatmul.bf16.gmra.mxu0 %v1259_v60  ;;  %755 = vmatmul.bf16.gmra.mxu2 %v1323_v61 }
  0x7a   : > { %804 = vmatmul.bf16.gmra.mxu1 %v1263_v62  ;;  %844 = vmatmul.bf16.gmra.mxu3 %v1327_v63 }
  0x89   : > { %720 = vmatmul.bf16.gmra.mxu0 %v1267_v8  ;;  %760 = vmatmul.bf16.gmra.mxu2 %v1331_v9 }
  0x8a   : > { %809 = vmatmul.bf16.gmra.mxu1 %v1271_v10  ;;  %849 = vmatmul.bf16.gmra.mxu3 %v1335_v11 }
  0x99   : > { %725 = vmatmul.bf16.gmra.mxu0 %v1275_v20  ;;  %765 = vmatmul.bf16.gmra.mxu2 %v1339_v21 }
  0x9a   : > { %814 = vmatmul.bf16.gmra.mxu1 %v1279_v22  ;;  %854 = vmatmul.bf16.gmra.mxu3 %v1343_v23 }
  0xa9   : > { %730 = vmatmul.bf16.gmra.mxu0 %v1283_v32  ;;  %770 = vmatmul.bf16.gmra.mxu2 %v1347_v33 }
  0xaa   : > { %819 = vmatmul.bf16.gmra.mxu1 %v1287_v34  ;;  %859 = vmatmul.bf16.gmra.mxu3 %v1351_v35 }
  0xb9   : > { %735 = vmatmul.bf16.gmra.mxu0 %v1291_v44  ;;  %775 = vmatmul.bf16.gmra.mxu2 %v1355_v45 }
  0xba   : > { %824 = vmatmul.bf16.gmra.mxu1 %v1295_v46  ;;  %864 = vmatmul.bf16.gmra.mxu3 %v1359_v47 }
  0xc6   : > { %v701_v48 = vpop.f32.mrf.mxu0 }
  0xc7   : > { %v790_v50 = vpop.f32.mrf.mxu1 }
  0xc8   : > { %v791_v51 = vadd.f32 %v790_v50, %v701_v48 }
  0xca   : > { %v973_v53 = vmul.f32 %v1938_v49, %v791_v51 }
  0xcc   : > { %v1009_v54 = vadd.f32 %v1943_v52, %v973_v53  ;;  %v741_v55 = vpop.f32.mrf.mxu2 }
  0xcd   : > { %v830_v56 = vpop.f32.mrf.mxu3 }
  0xce   : > { %1041 = vst [vmem:[%s1949_s9] sm:$0xff] %v1009_v54  ;;  %v831_v57 = vadd.f32 %v830_v56, %v741_v55  ;;  %v703_v58 = vpop.f32.mrf.mxu0 }
  0xcf   : > { %v792_v59 = vpop.f32.mrf.mxu1 }
  0xd0   : > { %v989_v60 = vmul.f32 %v1938_v49, %v831_v57  ;;  %v793_v61 = vadd.f32 %v792_v59, %v703_v58 }
  0xd2   : > { %v1025_v62 = vadd.f32 %v1943_v52, %v989_v60  ;;  %v974_v63 = vmul.f32 %v1938_v49, %v793_v61 }
  0xd4   : > { %1057 = vst [vmem:[%s1949_s9 + $0x80] sm:$0xff] %v1025_v62  ;;  %v1010_v0 = vadd.f32 %v1943_v52, %v974_v63  ;;  %v743_v1 = vpop.f32.mrf.mxu2 }
  0xd5   : > { %v832_v2 = vpop.f32.mrf.mxu3 }
  0xd6   : > { %1042 = vst [vmem:[%s1949_s9 + $0x8] sm:$0xff] %v1010_v0  ;;  %v833_v3 = vadd.f32 %v832_v2, %v743_v1  ;;  %v706_v4 = vpop.f32.mrf.mxu0 }
  0xd7   : > { %v795_v5 = vpop.f32.mrf.mxu1 }
  0xd8   : > { %v990_v6 = vmul.f32 %v1938_v49, %v833_v3  ;;  %v796_v7 = vadd.f32 %v795_v5, %v706_v4 }
  0xda   : > { %v1026_v8 = vadd.f32 %v1943_v52, %v990_v6  ;;  %v975_v9 = vmul.f32 %v1938_v49, %v796_v7 }
  0xdc   : > { %1058 = vst [vmem:[%s1949_s9 + $0x88] sm:$0xff] %v1026_v8  ;;  %v1011_v10 = vadd.f32 %v1943_v52, %v975_v9  ;;  %v746_v11 = vpop.f32.mrf.mxu2 }
  0xdd   : > { %v835_v12 = vpop.f32.mrf.mxu3 }
  0xde   : > { %1043 = vst [vmem:[%s1949_s9 + $0x10] sm:$0xff] %v1011_v10  ;;  %v836_v13 = vadd.f32 %v835_v12, %v746_v11  ;;  %v708_v14 = vpop.f32.mrf.mxu0 }
  0xdf   : > { %v797_v15 = vpop.f32.mrf.mxu1 }
  0xe0   : > { %v991_v16 = vmul.f32 %v1938_v49, %v836_v13  ;;  %v798_v17 = vadd.f32 %v797_v15, %v708_v14 }
  0xe2   : > { %v1027_v18 = vadd.f32 %v1943_v52, %v991_v16  ;;  %v976_v19 = vmul.f32 %v1938_v49, %v798_v17 }
  0xe4   : > { %1059 = vst [vmem:[%s1949_s9 + $0x90] sm:$0xff] %v1027_v18  ;;  %v1012_v20 = vadd.f32 %v1943_v52, %v976_v19  ;;  %v748_v21 = vpop.f32.mrf.mxu2 }
  0xe5   : > { %v837_v22 = vpop.f32.mrf.mxu3 }
  0xe6   : > { %1044 = vst [vmem:[%s1949_s9 + $0x18] sm:$0xff] %v1012_v20  ;;  %v838_v23 = vadd.f32 %v837_v22, %v748_v21  ;;  %v711_v24 = vpop.f32.mrf.mxu0 }
  0xe7   : > { %v800_v25 = vpop.f32.mrf.mxu1 }
  0xe8   : > { %v992_v26 = vmul.f32 %v1938_v49, %v838_v23  ;;  %v801_v27 = vadd.f32 %v800_v25, %v711_v24 }
  0xea   : > { %v1028_v28 = vadd.f32 %v1943_v52, %v992_v26  ;;  %v977_v29 = vmul.f32 %v1938_v49, %v801_v27 }
  0xec   : > { %1060 = vst [vmem:[%s1949_s9 + $0x98] sm:$0xff] %v1028_v28  ;;  %v1013_v30 = vadd.f32 %v1943_v52, %v977_v29  ;;  %v751_v31 = vpop.f32.mrf.mxu2 }
  0xed   : > { %v840_v32 = vpop.f32.mrf.mxu3 }
  0xee   : > { %1045 = vst [vmem:[%s1949_s9 + $0x20] sm:$0xff] %v1013_v30  ;;  %v841_v33 = vadd.f32 %v840_v32, %v751_v31  ;;  %v713_v34 = vpop.f32.mrf.mxu0 }
  0xef   : > { %v802_v35 = vpop.f32.mrf.mxu1 }
  0xf0   : > { %v993_v36 = vmul.f32 %v1938_v49, %v841_v33  ;;  %v803_v37 = vadd.f32 %v802_v35, %v713_v34 }
  0xf2   : > { %v1029_v38 = vadd.f32 %v1943_v52, %v993_v36  ;;  %v978_v39 = vmul.f32 %v1938_v49, %v803_v37 }
  0xf4   : > { %1061 = vst [vmem:[%s1949_s9 + $0xa0] sm:$0xff] %v1029_v38  ;;  %v1014_v40 = vadd.f32 %v1943_v52, %v978_v39  ;;  %v753_v41 = vpop.f32.mrf.mxu2 }
  0xf5   : > { %v842_v42 = vpop.f32.mrf.mxu3 }
  0xf6   : > { %1046 = vst [vmem:[%s1949_s9 + $0x28] sm:$0xff] %v1014_v40  ;;  %v843_v43 = vadd.f32 %v842_v42, %v753_v41  ;;  %v716_v44 = vpop.f32.mrf.mxu0 }
  0xf7   : > { %v805_v45 = vpop.f32.mrf.mxu1 }
  0xf8   : > { %v994_v46 = vmul.f32 %v1938_v49, %v843_v43  ;;  %v806_v47 = vadd.f32 %v805_v45, %v716_v44 }
  0xfa   : > { %v1030_v48 = vadd.f32 %v1943_v52, %v994_v46  ;;  %v979_v50 = vmul.f32 %v1938_v49, %v806_v47 }
  0xfc   : > { %1062 = vst [vmem:[%s1949_s9 + $0xa8] sm:$0xff] %v1030_v48  ;;  %v1015_v51 = vadd.f32 %v1943_v52, %v979_v50  ;;  %v756_v53 = vpop.f32.mrf.mxu2 }
  0xfd   : > { %v845_v54 = vpop.f32.mrf.mxu3 }
  0xfe   : > { %1047 = vst [vmem:[%s1949_s9 + $0x30] sm:$0xff] %v1015_v51  ;;  %v846_v55 = vadd.f32 %v845_v54, %v756_v53  ;;  %v718_v56 = vpop.f32.mrf.mxu0 }
  0xff   : > { %v807_v57 = vpop.f32.mrf.mxu1 }
 0x100   : > { %v995_v58 = vmul.f32 %v1938_v49, %v846_v55  ;;  %v808_v59 = vadd.f32 %v807_v57, %v718_v56 }
 0x102   : > { %v1031_v60 = vadd.f32 %v1943_v52, %v995_v58  ;;  %v980_v61 = vmul.f32 %v1938_v49, %v808_v59 }
 0x104   : > { %1063 = vst [vmem:[%s1949_s9 + $0xb0] sm:$0xff] %v1031_v60  ;;  %v1016_v62 = vadd.f32 %v1943_v52, %v980_v61  ;;  %v758_v63 = vpop.f32.mrf.mxu2 }
 0x105   : > { %v847_v0 = vpop.f32.mrf.mxu3 }
 0x106   : > { %1048 = vst [vmem:[%s1949_s9 + $0x38] sm:$0xff] %v1016_v62  ;;  %v848_v1 = vadd.f32 %v847_v0, %v758_v63  ;;  %v721_v2 = vpop.f32.mrf.mxu0 }
 0x107   : > { %v810_v3 = vpop.f32.mrf.mxu1 }
 0x108   : > { %v996_v4 = vmul.f32 %v1938_v49, %v848_v1  ;;  %v811_v5 = vadd.f32 %v810_v3, %v721_v2 }
 0x10a   : > { %v1032_v6 = vadd.f32 %v1943_v52, %v996_v4  ;;  %v981_v7 = vmul.f32 %v1938_v49, %v811_v5 }
 0x10c   : > { %1064 = vst [vmem:[%s1949_s9 + $0xb8] sm:$0xff] %v1032_v6  ;;  %v1017_v8 = vadd.f32 %v1943_v52, %v981_v7  ;;  %v761_v9 = vpop.f32.mrf.mxu2 }
 0x10d   : > { %v850_v10 = vpop.f32.mrf.mxu3 }
 0x10e   : > { %1049 = vst [vmem:[%s1949_s9 + $0x40] sm:$0xff] %v1017_v8  ;;  %v851_v11 = vadd.f32 %v850_v10, %v761_v9  ;;  %v723_v12 = vpop.f32.mrf.mxu0 }
 0x10f   : > { %v812_v13 = vpop.f32.mrf.mxu1 }
 0x110   : > { %v997_v14 = vmul.f32 %v1938_v49, %v851_v11  ;;  %v813_v15 = vadd.f32 %v812_v13, %v723_v12 }
 0x112   : > { %v1033_v16 = vadd.f32 %v1943_v52, %v997_v14  ;;  %v982_v17 = vmul.f32 %v1938_v49, %v813_v15 }
 0x114   : > { %1065 = vst [vmem:[%s1949_s9 + $0xc0] sm:$0xff] %v1033_v16  ;;  %v1018_v18 = vadd.f32 %v1943_v52, %v982_v17  ;;  %v763_v19 = vpop.f32.mrf.mxu2 }
 0x115   : > { %v852_v20 = vpop.f32.mrf.mxu3 }
 0x116   : > { %1050 = vst [vmem:[%s1949_s9 + $0x48] sm:$0xff] %v1018_v18  ;;  %v853_v21 = vadd.f32 %v852_v20, %v763_v19  ;;  %v726_v22 = vpop.f32.mrf.mxu0 }
 0x117   : > { %v815_v23 = vpop.f32.mrf.mxu1 }
 0x118   : > { %v998_v24 = vmul.f32 %v1938_v49, %v853_v21  ;;  %v816_v25 = vadd.f32 %v815_v23, %v726_v22 }
 0x11a   : > { %v1034_v26 = vadd.f32 %v1943_v52, %v998_v24  ;;  %v983_v27 = vmul.f32 %v1938_v49, %v816_v25 }
 0x11c   : > { %1066 = vst [vmem:[%s1949_s9 + $0xc8] sm:$0xff] %v1034_v26  ;;  %v1019_v28 = vadd.f32 %v1943_v52, %v983_v27  ;;  %v766_v29 = vpop.f32.mrf.mxu2 }
 0x11d   : > { %v855_v30 = vpop.f32.mrf.mxu3 }
 0x11e   : > { %1051 = vst [vmem:[%s1949_s9 + $0x50] sm:$0xff] %v1019_v28  ;;  %v856_v31 = vadd.f32 %v855_v30, %v766_v29  ;;  %v728_v32 = vpop.f32.mrf.mxu0 }
 0x11f   : > { %v817_v33 = vpop.f32.mrf.mxu1 }
 0x120   : > { %v999_v34 = vmul.f32 %v1938_v49, %v856_v31  ;;  %v818_v35 = vadd.f32 %v817_v33, %v728_v32 }
 0x122   : > { %v1035_v36 = vadd.f32 %v1943_v52, %v999_v34  ;;  %v984_v37 = vmul.f32 %v1938_v49, %v818_v35 }
 0x124   : > { %1067 = vst [vmem:[%s1949_s9 + $0xd0] sm:$0xff] %v1035_v36  ;;  %v1020_v38 = vadd.f32 %v1943_v52, %v984_v37  ;;  %v768_v39 = vpop.f32.mrf.mxu2 }
 0x125   : > { %v857_v40 = vpop.f32.mrf.mxu3 }
 0x126   : > { %1052 = vst [vmem:[%s1949_s9 + $0x58] sm:$0xff] %v1020_v38  ;;  %v858_v41 = vadd.f32 %v857_v40, %v768_v39  ;;  %v731_v42 = vpop.f32.mrf.mxu0 }
 0x127   : > { %v820_v43 = vpop.f32.mrf.mxu1 }
 0x128   : > { %v1000_v44 = vmul.f32 %v1938_v49, %v858_v41  ;;  %v821_v45 = vadd.f32 %v820_v43, %v731_v42 }
 0x12a   : > { %v1036_v46 = vadd.f32 %v1943_v52, %v1000_v44  ;;  %v985_v47 = vmul.f32 %v1938_v49, %v821_v45 }
 0x12c   : > { %1068 = vst [vmem:[%s1949_s9 + $0xd8] sm:$0xff] %v1036_v46  ;;  %v1021_v48 = vadd.f32 %v1943_v52, %v985_v47  ;;  %v771_v50 = vpop.f32.mrf.mxu2 }
 0x12d   : > { %v860_v51 = vpop.f32.mrf.mxu3 }
 0x12e   : > { %1053 = vst [vmem:[%s1949_s9 + $0x60] sm:$0xff] %v1021_v48  ;;  %v861_v53 = vadd.f32 %v860_v51, %v771_v50  ;;  %v733_v54 = vpop.f32.mrf.mxu0 }
 0x12f   : > { %v822_v55 = vpop.f32.mrf.mxu1 }
 0x130   : > { %v1001_v56 = vmul.f32 %v1938_v49, %v861_v53  ;;  %v823_v57 = vadd.f32 %v822_v55, %v733_v54 }
 0x132   : > { %v1037_v58 = vadd.f32 %v1943_v52, %v1001_v56  ;;  %v986_v59 = vmul.f32 %v1938_v49, %v823_v57 }
 0x134   : > { %1069 = vst [vmem:[%s1949_s9 + $0xe0] sm:$0xff] %v1037_v58  ;;  %v1022_v60 = vadd.f32 %v1943_v52, %v986_v59  ;;  %v773_v61 = vpop.f32.mrf.mxu2 }
 0x135   : > { %v862_v62 = vpop.f32.mrf.mxu3 }
 0x136   : > { %1054 = vst [vmem:[%s1949_s9 + $0x68] sm:$0xff] %v1022_v60  ;;  %v863_v63 = vadd.f32 %v862_v62, %v773_v61  ;;  %v736_v0 = vpop.f32.mrf.mxu0 }
 0x137   : > { %v825_v1 = vpop.f32.mrf.mxu1 }
 0x138   : > { %v1002_v2 = vmul.f32 %v1938_v49, %v863_v63  ;;  %v826_v3 = vadd.f32 %v825_v1, %v736_v0 }
 0x13a   : > { %v1038_v4 = vadd.f32 %v1943_v52, %v1002_v2  ;;  %v987_v5 = vmul.f32 %v1938_v49, %v826_v3 }
 0x13c   : > { %1070 = vst [vmem:[%s1949_s9 + $0xe8] sm:$0xff] %v1038_v4  ;;  %v1023_v6 = vadd.f32 %v1943_v52, %v987_v5  ;;  %v776_v7 = vpop.f32.mrf.mxu2 }
 0x13d   : > { %v865_v8 = vpop.f32.mrf.mxu3 }
 0x13e   : > { %1055 = vst [vmem:[%s1949_s9 + $0x70] sm:$0xff] %v1023_v6  ;;  %v866_v9 = vadd.f32 %v865_v8, %v776_v7  ;;  %v738_v10 = vpop.f32.mrf.mxu0 }
 0x13f   : > { %v827_v11 = vpop.f32.mrf.mxu1 }
 0x140   : > { %v1003_v12 = vmul.f32 %v1938_v49, %v866_v9  ;;  %v828_v13 = vadd.f32 %v827_v11, %v738_v10 }
 0x142   : > { %v1039_v14 = vadd.f32 %v1943_v52, %v1003_v12  ;;  %v988_v15 = vmul.f32 %v1938_v49, %v828_v13 }
 0x144   : > { %1071 = vst [vmem:[%s1949_s9 + $0xf0] sm:$0xff] %v1039_v14  ;;  %v1024_v16 = vadd.f32 %v1943_v52, %v988_v15  ;;  %v778_v17 = vpop.f32.mrf.mxu2 }
 0x145   : > { %v867_v18 = vpop.f32.mrf.mxu3 }
 0x146   : > { %1056 = vst [vmem:[%s1949_s9 + $0x78] sm:$0xff] %v1024_v16  ;;  %v868_v19 = vadd.f32 %v867_v18, %v778_v17 }
 0x148   : > { %v1004_v20 = vmul.f32 %v1938_v49, %v868_v19 }
 0x14a   : > { %v1040_v21 = vadd.f32 %v1943_v52, %v1004_v20 }
 0x14c   : > { %1072 = vst [vmem:[%s1949_s9 + $0xf8] sm:$0xff] %v1040_v21 }
 0x14d   : > { %1664 = shalt.err (!%p1661_p12)
}
 0x14e   : > { %s1730_s10 = smov 128   ;;  %s1731_s23 = smov 8  }
 0x14f   : > { %1502 = dma.vmem_to_hbm [thread:$0]  (%p1835_p3), %s1088_s5, 4096, %s1090_s18, %s1074_s6, %s1730_s10, %s1730_s10, %s1731_s23  }
 0x150 PF: > { %p1519_p13 = scmp.ge.s32.totalorder %s1723_s20, 2  ;;  %s1104_s25 = sand.u32 1, %s1703_s15  }
 0x151   : > { %s1105_s30 = scalar_lea.sflag [#allocation5], %s1104_s25 }
 0x152   : > { %p1513_p0 = pnand %p1519_p13, %p1806_p6 }
 0x154   : > { %p1514_p5 = pneg %p1513_p0 }
 0x156   : > { %1698 = dma.done.wait (%p1514_p5), %s1105_s30, 4096  }
 0x157   : > { %1700 = vsyncadd (%p1514_p5), %s1105_s30, 4294963200  ;;  %s21_s20 = sadd.s32 1, %s1723_s20   ;;  %s2099_s12 = sld [smem:[#allocation12_spill]] }
 0x158   : > { %p18_p7 = scmp.ge.s32.totalorder %s21_s20, 10   ;;  %s2100_s15 = smov %s1707_s16 }
 0x159   : > { %s2101_s16 = smov %s1711_s17  ;;  %s2102_s17 = smov %s1844_s22 }
 0x15a   : > { %s2103_s18 = smov %s1719_s19  ;;  %20 = sbr.rel (!%p18_p7) target bundleno = 9 (0x9), region = 100 }
 0x15d   : > { %s2104_s19 = smov %s2099_s12 }
 0x15f   :  { %1111 = vsyncpa [#allocation4], 1 }
 0x160   :  { %1113 = vsyncpa [#allocation4 + $0x1], 1 }
 0x161   :  { %1114 = vsyncpa [#allocation7], 1 }
 0x162   :  { %1115 = vsyncpa [#allocation5], 1 }
 0x163   :  { %1117 = vsyncpa [#allocation5 + $0x1], 1 }

</bundles_post_ra>
